<compile_context>
chip_gen: v7x
topology: tpu7x:2x2x1
jax: 0.10.0
libtpu: 0.0.40
codegen_flags: <defaults>
</compile_context>

<pallas_src>
import functools

import jax
import jax.numpy as jnp
import numpy as np
from jax.experimental import pallas as pl
from jax.experimental.pallas import tpu as pltpu


def _round_up(a, b):
    return (a + b - 1) // b * b


def mlp_kernel(x_ref, wh_ref, wo_ref, bh_ref, bo_ref, out_ref, *,
               hid_layout, mm_dtype):
    """One folded-batch tile of the MLP forward.

    x_ref  : (tb, in_lanes)         folded activations (F original rows per kernel row)
    wh_ref : (wh_rows, hid_lanes)   block-diag W0 + hidden Ws (VMEM-resident, const map)
    wo_ref : (hid_lanes, out_lanes) block-diag output W (VMEM-resident)
    bh_ref : (bh_rows, hid_lanes)   f32 per-layer hidden biases (tiled per fold group)
    bo_ref : (8, out_lanes)         f32: row0 out-bias, row1 scale [1,1,1,1,1,T0]*F,
                                    row2 exp-mask (1.0 where column gets exp'd)
    out_ref: (tb, out_lanes)        lane-minimal output tile (no 128-wide padding)
    """
    h = x_ref[...]
    for i, (ws, wr) in enumerate(hid_layout):
        z = jnp.dot(h, wh_ref[ws:ws + wr, :],
                    preferred_element_type=jnp.float32) + bh_ref[i:i + 1, :]
        h = jnp.tanh(z)                      # f32 VPU/EUP (works on v5e too)
        if mm_dtype is not None:
            h = h.astype(mm_dtype)           # bf16 MXU operands, f32 accumulate
    z = jnp.dot(h, wo_ref[...],
                preferred_element_type=jnp.float32) + bo_ref[0:1, :]
    scale = bo_ref[1:2, :]
    emask = bo_ref[2:3, :]
    y = jnp.where(emask > 0.0, jnp.exp(z) * scale, z)
    out_ref[...] = jnp.clip(y, 1e-10, 1e10)


def make_params(key, input_size, hidden_size, output_size, num_layers):
    """Deterministic Linear params, torch-style uniform(-1/sqrt(fan_in), 1/sqrt(fan_in))."""
    sizes = [(input_size, hidden_size)]
    for _ in range(num_layers - 1):
        sizes.append((hidden_size, hidden_size))
    sizes.append((hidden_size, output_size))

    params = []
    for fan_in, fan_out in sizes:
        key, kw, kb = jax.random.split(key, 3)
        bound = 1.0 / np.sqrt(np.float32(fan_in))
        w = jax.random.uniform(kw, (fan_in, fan_out), jnp.float32, -bound, bound)
        b = jax.random.uniform(kb, (fan_out,), jnp.float32, -bound, bound)
        params.append((w, b))
    return params


def pack_params(params, t0, *, weight_dtype=jnp.float32):
    """Pack weights as lane-folded block-diagonal buffers (done once on the host)."""
    num_linear = len(params)
    input_size = params[0][0].shape[0]
    hidden_size = params[0][0].shape[1]
    output_size = params[-1][0].shape[1]

    # Fold F original batch rows per kernel row so the 128 lanes are dense.
    if hidden_size <= 128 and 128 % hidden_size == 0:
        fold = 128 // hidden_size
    else:
        fold = 1

    in_lanes = _round_up(fold * input_size, 8)
    hid_lanes = _round_up(fold * hidden_size, 128)
    out_lanes = fold * output_size
    n_hid = num_linear - 1

    # Hidden-path weights: block-diagonal, stacked by rows into one buffer.
    hid_layout = []
    blocks = []
    row = 0
    w0 = np.zeros((in_lanes, hid_lanes), np.float32)
    w0_np = np.asarray(params[0][0])
    for g in range(fold):
        w0[g * input_size:(g + 1) * input_size,
           g * hidden_size:(g + 1) * hidden_size] = w0_np
    blocks.append(w0)
    hid_layout.append((row, in_lanes))
    row += in_lanes
    for i in range(1, n_hid):
        wi = np.zeros((hid_lanes, hid_lanes), np.float32)
        wi_np = np.asarray(params[i][0])
        for g in range(fold):
            wi[g * hidden_size:(g + 1) * hidden_size,
               g * hidden_size:(g + 1) * hidden_size] = wi_np
        blocks.append(wi)
        hid_layout.append((row, hid_lanes))
        row += hid_lanes
    wh = np.concatenate(blocks, axis=0)

    # Output weight: block-diagonal, only out_lanes columns -> minimal writeback.
    wo = np.zeros((hid_lanes, out_lanes), np.float32)
    wo_np = np.asarray(params[-1][0])
    for g in range(fold):
        wo[g * hidden_size:(g + 1) * hidden_size,
           g * output_size:(g + 1) * output_size] = wo_np

    # f32 aux buffers (biases / epilogue data), passed as kernel inputs (no captured consts).
    bh = np.zeros((_round_up(max(n_hid, 1), 8), hid_lanes), np.float32)
    for i in range(n_hid):
        bh[i, :fold * hidden_size] = np.tile(np.asarray(params[i][1]).reshape(-1), fold)
    bo = np.zeros((8, out_lanes), np.float32)
    bo[0] = np.tile(np.asarray(params[-1][1]).reshape(-1), fold)
    scale = np.zeros((output_size,), np.float32)
    scale[:min(5, output_size)] = 1.0
    if output_size > 5:
        scale[5] = float(t0)            # runtime data -> changing T0 never recompiles
    bo[1] = np.tile(scale, fold)
    emask = np.zeros((output_size,), np.float32)
    emask[:min(6, output_size)] = 1.0
    bo[2] = np.tile(emask, fold)

    cfg = dict(fold=fold, input_size=input_size, output_size=output_size,
               in_lanes=in_lanes, hid_lanes=hid_lanes, out_lanes=out_lanes,
               hid_layout=tuple(hid_layout), wh_rows=int(wh.shape[0]),
               bh_rows=int(bh.shape[0]), weight_dtype=weight_dtype)
    return dict(wh=jnp.asarray(wh, weight_dtype), wo=jnp.asarray(wo, weight_dtype),
                bh=jnp.asarray(bh), bo=jnp.asarray(bo), cfg=cfg)


def neural_network_forward(x, packed, *, tile_b=1024):
    cfg = packed["cfg"]
    fold = cfg["fold"]
    input_size = cfg["input_size"]
    output_size = cfg["output_size"]
    in_lanes = cfg["in_lanes"]
    hid_lanes = cfg["hid_lanes"]
    out_lanes = cfg["out_lanes"]
    wdt = cfg["weight_dtype"]
    mm_dtype = None if wdt == jnp.float32 else wdt

    batch = x.shape[0]
    b_fold = pl.cdiv(batch, fold)
    b_fold_pad = _round_up(b_fold, 8)
    tb = min(_round_up(tile_b, 8), b_fold_pad)
    # Keep >= 2 grid steps when there is enough work so both v7x TensorCores get a tile.
    if tb >= b_fold_pad and b_fold_pad >= 16:
        tb = _round_up(pl.cdiv(b_fold_pad, 2), 8)
    b_fold_pad = _round_up(b_fold_pad, tb)

    rows_needed = b_fold_pad * fold
    x_c = x.astype(jnp.float32 if mm_dtype is None else mm_dtype)
    if rows_needed != batch:
        x_c = jnp.pad(x_c, ((0, rows_needed - batch), (0, 0)))   # batch-axis pad only
    x_fold = x_c.reshape(b_fold_pad, fold * input_size)          # free row-major reshape
    if in_lanes != fold * input_size:
        x_fold = jnp.pad(x_fold, ((0, 0), (0, in_lanes - fold * input_size)))

    kernel = functools.partial(mlp_kernel,
                               hid_layout=cfg["hid_layout"], mm_dtype=mm_dtype)

    out = pl.pallas_call(
        kernel,
        out_shape=jax.ShapeDtypeStruct((b_fold_pad, out_lanes), jnp.float32),
        grid_spec=pltpu.PrefetchScalarGridSpec(
            num_scalar_prefetch=0,
            grid=(b_fold_pad // tb,),
            in_specs=[
                # activation tile: pipelined per batch tile
                pl.BlockSpec((tb, in_lanes), lambda i: (i, 0)),
                # weights / aux: constant index maps -> fetched once, VMEM-resident
                pl.BlockSpec((cfg["wh_rows"], hid_lanes), lambda i: (0, 0)),
                pl.BlockSpec((hid_lanes, out_lanes), lambda i: (0, 0)),
                pl.BlockSpec((cfg["bh_rows"], hid_lanes), lambda i: (0, 0)),
                pl.BlockSpec((8, out_lanes), lambda i: (0, 0)),
            ],
            out_specs=pl.BlockSpec((tb, out_lanes), lambda i: (i, 0)),
        ),
        compiler_params=pltpu.CompilerParams(
            dimension_semantics=("parallel",)),     # megacore-shardable batch axis
    )(x_fold, packed["wh"], packed["wo"], packed["bh"], packed["bo"])

    # Free reshape back to one original row per group, drop padded rows.
    return out.reshape(b_fold_pad * fold, output_size)[:batch]


def reference_forward(x, params, t0):
    h = x
    for w, b in params[:-1]:
        h = jnp.tanh(h @ w + b)
    w, b = params[-1]
    y = h @ w + b
    col = jax.lax.broadcasted_iota(jnp.int32, y.shape, 1)
    y_exp = jnp.exp(y)
    y = jnp.where(col < 6, jnp.where(col == 5, y_exp * t0, y_exp), y)
    return jnp.clip(y, 1e-10, 1e10)


if __name__ == "__main__":
    # Module hyperparameters (forward exponentiates columns 0..5, so output_size >= 6).
    input_size_NN = 8
    hidden_size_NN = 32
    output_size_NN = 6
    num_layers_NN = 3
    T0 = 1000.0

    key = jax.random.PRNGKey(0)
    key, kp = jax.random.split(key)
    params = make_params(kp, input_size_NN, hidden_size_NN, output_size_NN, num_layers_NN)

    packed_f32 = pack_params(params, T0)                              # tight validation path
    packed_bf16 = pack_params(params, T0, weight_dtype=jnp.bfloat16)  # bf16 MXU operands

    # Small batch (single grid step, ragged fold padding).
    key, kx = jax.random.split(key)
    x_small = jax.random.normal(kx, (8, input_size_NN), dtype=jnp.float32)
    out_small = jax.block_until_ready(neural_network_forward(x_small, packed_f32))
    ref_small = reference_forward(x_small, params, T0)
    assert out_small.shape == (8, output_size_NN)
    assert jnp.allclose(out_small, ref_small, rtol=1e-5, atol=1e-5), "mismatch (batch=8)"

    # Ragged batch (not a multiple of the fold factor).
    key, kx1 = jax.random.split(key)
    x_rag = jax.random.normal(kx1, (37, input_size_NN), dtype=jnp.float32)
    out_rag = jax.block_until_ready(neural_network_forward(x_rag, packed_f32))
    ref_rag = reference_forward(x_rag, params, T0)
    assert out_rag.shape == (37, output_size_NN)
    assert jnp.allclose(out_rag, ref_rag, rtol=1e-5, atol=1e-5), "mismatch (batch=37)"

    # Larger batch -> 2 grid steps on the "parallel" batch axis.
    key, kx2 = jax.random.split(key)
    x_big = jax.random.normal(kx2, (512, input_size_NN), dtype=jnp.float32)
    out_big = jax.block_until_ready(neural_network_forward(x_big, packed_f32))
    ref_big = reference_forward(x_big, params, T0)
    assert out_big.shape == (512, output_size_NN)
    assert jnp.allclose(out_big, ref_big, rtol=1e-5, atol=1e-5), "mismatch (batch=512)"

    # bf16 MXU operands (f32 accumulate) — sanity-checked loosely against the f32 reference.
    out_bf16 = jax.block_until_ready(neural_network_forward(x_big, packed_bf16))
    assert out_bf16.shape == (512, output_size_NN)
    assert bool(jnp.all(jnp.isfinite(out_bf16)))
    rel = jnp.max(jnp.abs(out_bf16 - ref_big) / jnp.maximum(jnp.abs(ref_big), 1e-6))
    assert float(rel) < 0.25, f"bf16 path too far from f32 reference: {float(rel)}"

    print("KERNEL_OK")
</pallas_src>

<mosaic_0001>
module attributes {stable_mosaic.version = 11 : i64} {
  func.func @mlp_kernel(%arg0: i32, %arg1: memref<8x32xf32, #tpu.memory_space<vmem>>, %arg2: memref<288x128xf32, #tpu.memory_space<vmem>>, %arg3: memref<128x24xf32, #tpu.memory_space<vmem>>, %arg4: memref<8x128xf32, #tpu.memory_space<vmem>>, %arg5: memref<8x24xf32, #tpu.memory_space<vmem>>, %arg6: memref<8x24xf32, #tpu.memory_space<vmem>>) attributes {dimension_semantics = [#tpu.dimension_semantics<parallel>], iteration_bounds = array<i64: 1>, scalar_prefetch = 0 : i64, scratch_operands = 0 : i64, tpu.core_type = #tpu.core_type<tc>, window_params = [{transform_indices = @transform_0, window_bounds = array<i64: 8, 32>}, {pipeline_mode = #tpu.pipeline_mode<synchronous>, transform_indices = @transform_1, window_bounds = array<i64: 288, 128>}, {pipeline_mode = #tpu.pipeline_mode<synchronous>, transform_indices = @transform_2, window_bounds = array<i64: 128, 24>}, {pipeline_mode = #tpu.pipeline_mode<synchronous>, transform_indices = @transform_3, window_bounds = array<i64: 8, 128>}, {pipeline_mode = #tpu.pipeline_mode<synchronous>, transform_indices = @transform_4, window_bounds = array<i64: 8, 24>}, {transform_indices = @transform_5, window_bounds = array<i64: 8, 24>}]} {
    %c0 = arith.constant 0 : index
    %c0_0 = arith.constant 0 : index
    %0 = vector.load %arg1[%c0, %c0_0] : memref<8x32xf32, #tpu.memory_space<vmem>>, vector<8x32xf32>
    %c0_1 = arith.constant 0 : index
    %c0_2 = arith.constant 0 : index
    %1 = vector.load %arg2[%c0_1, %c0_2] : memref<288x128xf32, #tpu.memory_space<vmem>>, vector<32x128xf32>
    %cst = arith.constant dense<0.000000e+00> : vector<8x128xf32>
    %2 = tpu.matmul %0, %1, %cst {dimension_numbers = #tpu.dot_dimension_numbers<[1], [0], [0], [1], [0, 0, 1, 1], [], []>} : vector<8x32xf32>, vector<32x128xf32>, vector<8x128xf32> -> vector<8x128xf32>
    %c0_3 = arith.constant 0 : index
    %c0_4 = arith.constant 0 : index
    %3 = vector.load %arg4[%c0_3, %c0_4] : memref<8x128xf32, #tpu.memory_space<vmem>>, vector<1x128xf32>
    %4 = vector.broadcast %3 : vector<1x128xf32> to vector<8x128xf32>
    %5 = arith.addf %2, %4 : vector<8x128xf32>
    %6 = math.tanh %5 : vector<8x128xf32>
    %c32 = arith.constant 32 : index
    %c0_5 = arith.constant 0 : index
    %7 = vector.load %arg2[%c32, %c0_5] : memref<288x128xf32, #tpu.memory_space<vmem>>, vector<128x128xf32>
    %cst_6 = arith.constant dense<0.000000e+00> : vector<8x128xf32>
    %8 = tpu.matmul %6, %7, %cst_6 {dimension_numbers = #tpu.dot_dimension_numbers<[1], [0], [0], [1], [0, 0, 1, 1], [], []>} : vector<8x128xf32>, vector<128x128xf32>, vector<8x128xf32> -> vector<8x128xf32>
    %c1 = arith.constant 1 : index
    %c0_7 = arith.constant 0 : index
    %9 = vector.load %arg4[%c1, %c0_7] : memref<8x128xf32, #tpu.memory_space<vmem>>, vector<1x128xf32>
    %10 = vector.broadcast %9 : vector<1x128xf32> to vector<8x128xf32>
    %11 = arith.addf %8, %10 : vector<8x128xf32>
    %12 = math.tanh %11 : vector<8x128xf32>
    %c160 = arith.constant 160 : index
    %c0_8 = arith.constant 0 : index
    %13 = vector.load %arg2[%c160, %c0_8] : memref<288x128xf32, #tpu.memory_space<vmem>>, vector<128x128xf32>
    %cst_9 = arith.constant dense<0.000000e+00> : vector<8x128xf32>
    %14 = tpu.matmul %12, %13, %cst_9 {dimension_numbers = #tpu.dot_dimension_numbers<[1], [0], [0], [1], [0, 0, 1, 1], [], []>} : vector<8x128xf32>, vector<128x128xf32>, vector<8x128xf32> -> vector<8x128xf32>
    %c2 = arith.constant 2 : index
    %c0_10 = arith.constant 0 : index
    %15 = vector.load %arg4[%c2, %c0_10] : memref<8x128xf32, #tpu.memory_space<vmem>>, vector<1x128xf32>
    %16 = vector.broadcast %15 : vector<1x128xf32> to vector<8x128xf32>
    %17 = arith.addf %14, %16 : vector<8x128xf32>
    %18 = math.tanh %17 : vector<8x128xf32>
    %c0_11 = arith.constant 0 : index
    %c0_12 = arith.constant 0 : index
    %19 = vector.load %arg3[%c0_11, %c0_12] : memref<128x24xf32, #tpu.memory_space<vmem>>, vector<128x24xf32>
    %cst_13 = arith.constant dense<0.000000e+00> : vector<8x24xf32>
    %20 = tpu.matmul %18, %19, %cst_13 {dimension_numbers = #tpu.dot_dimension_numbers<[1], [0], [0], [1], [0, 0, 1, 1], [], []>} : vector<8x128xf32>, vector<128x24xf32>, vector<8x24xf32> -> vector<8x24xf32>
    %c0_14 = arith.constant 0 : index
    %c0_15 = arith.constant 0 : index
    %21 = vector.load %arg5[%c0_14, %c0_15] : memref<8x24xf32, #tpu.memory_space<vmem>>, vector<1x24xf32>
    %22 = vector.broadcast %21 : vector<1x24xf32> to vector<8x24xf32>
    %23 = arith.addf %20, %22 : vector<8x24xf32>
    %c1_16 = arith.constant 1 : index
    %c0_17 = arith.constant 0 : index
    %24 = vector.load %arg5[%c1_16, %c0_17] : memref<8x24xf32, #tpu.memory_space<vmem>>, vector<1x24xf32>
    %c2_18 = arith.constant 2 : index
    %c0_19 = arith.constant 0 : index
    %25 = vector.load %arg5[%c2_18, %c0_19] : memref<8x24xf32, #tpu.memory_space<vmem>>, vector<1x24xf32>
    %cst_20 = arith.constant 0.000000e+00 : f32
    %26 = vector.broadcast %cst_20 : f32 to vector<1x24xf32>
    %27 = arith.cmpf ogt, %25, %26 : vector<1x24xf32>
    %28 = math.exp %23 : vector<8x24xf32>
    %29 = vector.broadcast %24 : vector<1x24xf32> to vector<8x24xf32>
    %30 = arith.mulf %28, %29 : vector<8x24xf32>
    %31 = vector.shape_cast %27 : vector<1x24xi1> to vector<1x24xi1>
    %32 = vector.broadcast %31 : vector<1x24xi1> to vector<8x24xi1>
    %33 = arith.select %32, %30, %23 : vector<8x24xi1>, vector<8x24xf32>
    %cst_21 = arith.constant 1.000000e-10 : f32
    %cst_22 = arith.constant 1.000000e+10 : f32
    %34 = vector.broadcast %cst_21 : f32 to vector<8x24xf32>
    %35 = arith.maximumf %34, %33 : vector<8x24xf32>
    %36 = vector.broadcast %cst_22 : f32 to vector<8x24xf32>
    %37 = arith.minimumf %36, %35 : vector<8x24xf32>
    %c0_23 = arith.constant 0 : index
    %c0_24 = arith.constant 0 : index
    %38 = vector.load %arg6[%c0_23, %c0_24] : memref<8x24xf32, #tpu.memory_space<vmem>>, vector<8x24xf32>
    tpu.vector_store %arg6[%c0_23, %c0_24], %37 {strides = array<i32>} : memref<8x24xf32, #tpu.memory_space<vmem>>, vector<8x24xf32>,
    return
  }
  func.func @transform_0(%arg0: i32) -> (i32, i32) {
    %c0_i32 = arith.constant 0 : i32
    %c0_i32_0 = arith.constant 0 : i32
    return %arg0, %c0_i32 : i32, i32
  }
  func.func @transform_1(%arg0: i32) -> (i32, i32) {
    %c0_i32 = arith.constant 0 : i32
    %c0_i32_0 = arith.constant 0 : i32
    %c0_i32_1 = arith.constant 0 : i32
    return %c0_i32, %c0_i32_0 : i32, i32
  }
  func.func @transform_2(%arg0: i32) -> (i32, i32) {
    %c0_i32 = arith.constant 0 : i32
    %c0_i32_0 = arith.constant 0 : i32
    %c0_i32_1 = arith.constant 0 : i32
    return %c0_i32, %c0_i32_0 : i32, i32
  }
  func.func @transform_3(%arg0: i32) -> (i32, i32) {
    %c0_i32 = arith.constant 0 : i32
    %c0_i32_0 = arith.constant 0 : i32
    %c0_i32_1 = arith.constant 0 : i32
    return %c0_i32, %c0_i32_0 : i32, i32
  }
  func.func @transform_4(%arg0: i32) -> (i32, i32) {
    %c0_i32 = arith.constant 0 : i32
    %c0_i32_0 = arith.constant 0 : i32
    %c0_i32_1 = arith.constant 0 : i32
    return %c0_i32, %c0_i32_0 : i32, i32
  }
  func.func @transform_5(%arg0: i32) -> (i32, i32) {
    %c0_i32 = arith.constant 0 : i32
    %c0_i32_0 = arith.constant 0 : i32
    return %arg0, %c0_i32 : i32, i32
  }
}

</mosaic_0001>

<bundles_post_ra>
// kernel: tpu_custom_call.1
= control target key start
LH: loop header
LB: loop body
LE: loop exit
PB: predicated region body
PF: predicated region fallthrough
CT: control target
= control target key end

     0   :  { %10 = vsyncpa [#allocation3], 0  ;;  %s916_s0 = inlined_call_operand.vmem [shape: f32[8,32], index: 0, kind: input, shape index: {}]   ;;  %s917_s1 = inlined_call_operand.hbm [shape: f32[288,128], index: 1, kind: input, shape index: {}]   ;;  %s918_s2 = inlined_call_operand.vmem [shape: f32[128,24], index: 2, kind: input, shape index: {}]   ;;  %s919_s3 = inlined_call_operand.vmem [shape: f32[8,128], index: 3, kind: input, shape index: {}]   ;;  %s920_s4 = inlined_call_operand.vmem [shape: f32[8,24], index: 4, kind: input, shape index: {}]   ;;  %s921_s5 = inlined_call_operand.hbm [shape: f32[8,24], index: 5, kind: output, shape index: {}]  }
   0x1   :  { %11 = vsyncpa [#allocation4], 0  ;;  %s751_s18 = smov [#allocation2]   ;;  %s703_s22 = scalar_lea.hbm %s917_s1, 4608 }
   0x2   :  { %s19_s19 = sshll.u32 %s751_s18, 4  ;;  %p704_p0 = scmp.ne.s32.totalorder %s917_s1, %s703_s22  ;;  %s20_s19 = int_to_ptr.vmem [resolvable:$true] %s19_s19 }
   0x3   :  { %p707_p1 = scmp.lt.u32.totalorder %s703_s22, %s917_s1 }
   0x5   :  { %p709_p2 = pnand %p707_p1, %p704_p0 }
   0x7   :  { %712 = shalt.err (!%p709_p2)
}
   0x8   :  { %s713_s27 = scalar_lea.vmem %s20_s19, 4608  ;;  %p718_p4 = scmp.lt.s32.totalorder %s20_s19, %s20_s19 }
   0x9   :  { %p714_p3 = scmp.ne.s32.totalorder %s20_s19, %s713_s27  ;;  %p719_p5 = scmp.lt.s32.totalorder %s713_s27, %s713_s27 }
   0xb   :  { %p720_p6 = por %p719_p5, %p718_p4 }
   0xd   :  { %p721_p7 = pnand %p720_p6, %p714_p3 }
   0xf   :  { %724 = shalt.err (!%p721_p7)
}
  0x10   :  { %s752_s28 = smov 128   ;;  %s753_s29 = smov 8  }
  0x11   :  { %25 = dma.hbm_to_vmem [thread:$0]  %s917_s1, 4608, %s20_s19, [#allocation3], %s752_s28, %s752_s28, %s753_s29  }
  0x12   :  { %747 = dma.done.wait [#allocation3], 4608  }
  0x13   :  { %748 = vsyncadd [#allocation3], 4294962688  ;;  %v754_v0 = vmov 0.0|0.0   ;;  %vm755_vm0 = vmmov 0   ;;  %v756_v1 = vmov 0.0   ;;  %v36_v2 = vld [vmem:[#allocation2] sm:$0xff] }
  0x14   :  { %609 = vmatprep.subr.bf16.mxu0 %v754_v0  ;;  %501 = vmatprep.mubr.msk.f32.mxu0 %vm755_vm0, %v756_v1  ;;  %v37_v3 = vld [vmem:[#allocation2 + $0x8] sm:$0xff]  ;;  %v38_v4 = vld [vmem:[#allocation2 + $0x10] sm:$0xff]  ;;  %v39_v6 = vld [vmem:[#allocation2 + $0x18] sm:$0xff]  ;;  %vm45_vm1 = vcmask 261120   ;;  %s758_s22 = smov [#allocation5]   ;;  %vm414_vm4 = vcmask 195584  }
  0x15   :  { %615 = vmatprep.subr.bf16.mxu1 %v754_v0  ;;  %536 = vmatprep.mubr.msk.f32.mxu1 %vm755_vm0, %v756_v1  ;;  %v610_v5 = vpack.c.bf16 %v37_v3, %v36_v2  ;;  %v120_v7 = vld [vmem:[#allocation2 + $0x20] sm:$0xff]  ;;  %v121_v8 = vld [vmem:[#allocation2 + $0x28] sm:$0xff]  ;;  %v122_v9 = vld [vmem:[#allocation2 + $0x30] sm:$0xff]  ;;  %v613_v11 = vpack.c.bf16 %v39_v6, %v38_v4  ;;  %s422_s23 = sshll.u32 %s758_s22, 4  ;;  %s423_s23 = int_to_ptr.vmem [resolvable:$true] %s422_s23 }
  0x16   :  { %v123_v10 = vld [vmem:[#allocation2 + $0x38] sm:$0xff]  ;;  %v616_v12 = vpack.c.bf16 %v121_v8, %v120_v7  ;;  %v124_v14 = vld [vmem:[#allocation2 + $0x40] sm:$0xff]  ;;  %v125_v15 = vld [vmem:[#allocation2 + $0x48] sm:$0xff]  ;;  %s725_s24 = scalar_lea.vmem %s423_s23, 128  ;;  %p730_p9 = scmp.lt.s32.totalorder %s423_s23, %s423_s23 }
  0x17   :  { %611 = vmatpush3.bf16.msra.mxu0 %v610_v5  ;;  %v619_v13 = vpack.c.bf16 %v123_v10, %v122_v9  ;;  %v35_v16 = vld [vmem:[%s916_s0] sm:$0xff]  ;;  %v622_v17 = vpack.c.bf16 %v125_v15, %v124_v14  ;;  %v126_v18 = vld [vmem:[#allocation2 + $0x50] sm:$0xff]  ;;  %v127_v19 = vld [vmem:[#allocation2 + $0x58] sm:$0xff]  ;;  %p726_p8 = scmp.ne.s32.totalorder %s423_s23, %s725_s24  ;;  %p731_p10 = scmp.lt.s32.totalorder %s725_s24, %s725_s24 }
  0x18   :  { %612 = vmatprep.subr.bf16.mxu0 %v754_v0  ;;  %617 = vmatpush3.bf16.msra.mxu1 %v616_v12  ;;  %v625_v20 = vpack.c.bf16 %v127_v19, %v126_v18  ;;  %v128_v21 = vld [vmem:[#allocation2 + $0x60] sm:$0xff]  ;;  %v129_v22 = vld [vmem:[#allocation2 + $0x68] sm:$0xff]  ;;  %v130_v24 = vld [vmem:[#allocation2 + $0x70] sm:$0xff] }
  0x19   :  { %618 = vmatprep.subr.bf16.mxu1 %v754_v0  ;;  %v628_v23 = vpack.c.bf16 %v129_v22, %v128_v21  ;;  %v131_v25 = vld [vmem:[#allocation2 + $0x78] sm:$0xff]  ;;  %v132_v27 = vld [vmem:[#allocation2 + $0x80] sm:$0xff]  ;;  %v133_v28 = vld [vmem:[#allocation2 + $0x88] sm:$0xff]  ;;  %p732_p11 = por %p731_p10, %p730_p9 }
  0x1a   :  { %v631_v26 = vpack.c.bf16 %v131_v25, %v130_v24  ;;  %v634_v29 = vpack.c.bf16 %v133_v28, %v132_v27  ;;  %v134_v30 = vld [vmem:[#allocation2 + $0x90] sm:$0xff]  ;;  %v135_v31 = vld [vmem:[#allocation2 + $0x98] sm:$0xff]  ;;  %v212_v33 = vld [vmem:[#allocation2 + $0xa0] sm:$0xff] }
  0x1b   :  { %614 = vmatpush3.bf16.msra.mxu0 %v613_v11  ;;  %v637_v32 = vpack.c.bf16 %v135_v31, %v134_v30  ;;  %v213_v34 = vld [vmem:[#allocation2 + $0xa8] sm:$0xff]  ;;  %v214_v35 = vld [vmem:[#allocation2 + $0xb0] sm:$0xff]  ;;  %v215_v37 = vld [vmem:[#allocation2 + $0xb8] sm:$0xff]  ;;  %p733_p12 = pnand %p732_p11, %p726_p8 }
  0x1c   :  { %639 = vmatprep.subr.bf16.mxu0 %v754_v0  ;;  %620 = vmatpush3.bf16.msra.mxu1 %v619_v13  ;;  %v640_v36 = vpack.c.bf16 %v213_v34, %v212_v33  ;;  %v643_v38 = vpack.c.bf16 %v215_v37, %v214_v35  ;;  %v216_v39 = vld [vmem:[#allocation2 + $0xc0] sm:$0xff]  ;;  %v217_v40 = vld [vmem:[#allocation2 + $0xc8] sm:$0xff]  ;;  %v218_v42 = vld [vmem:[#allocation2 + $0xd0] sm:$0xff]  ;;  %v406_v34 = vlaneseq }
  0x1d   :  { %621 = vmatprep.subr.bf16.mxu1 %v754_v0  ;;  %v646_v41 = vpack.c.bf16 %v217_v40, %v216_v39  ;;  %v219_v43 = vld [vmem:[#allocation2 + $0xd8] sm:$0xff]  ;;  %v220_v45 = vld [vmem:[#allocation2 + $0xe0] sm:$0xff]  ;;  %v221_v46 = vld [vmem:[#allocation2 + $0xe8] sm:$0xff] }
  0x1e   :  { %502 = vmatmul.mubr.msk.f32.vlgmr.msra.gmra.mrb[0].mxu0 %vm45_vm1, %v35_v16  ;;  %v649_v44 = vpack.c.bf16 %v219_v43, %v218_v42  ;;  %v652_v47 = vpack.c.bf16 %v221_v46, %v220_v45  ;;  %v431_v48 = vld [vmem:[%s919_s3] ss:$0 sm:$0xff]  ;;  %v222_v53 = vld [vmem:[#allocation2 + $0xf0] sm:$0xff]  ;;  %v223_v54 = vld [vmem:[#allocation2 + $0xf8] sm:$0xff]  ;;  %v407_v39 = vshrl.u32 %v406_v34, 7 }
  0x1f   :  { %571 = vmatprep.mubr.msk.f32.mxu0 %vm755_vm0, %v756_v1  ;;  %641 = vmatpush3.bf16.msra.mxu0 %v640_v36  ;;  %v655_v55 = vpack.c.bf16 %v223_v54, %v222_v53  ;;  %v224_v56 = vld [vmem:[#allocation2 + $0x100] sm:$0xff]  ;;  %v225_v57 = vld [vmem:[#allocation2 + $0x108] sm:$0xff]  ;;  %v226_v59 = vld [vmem:[#allocation2 + $0x110] sm:$0xff] }
  0x20   :  { %623 = vmatpush3.bf16.msra.mxu1 %v622_v17  ;;  %642 = vmatprep.subr.bf16.mxu0 %v754_v0  ;;  %v658_v58 = vpack.c.bf16 %v225_v57, %v224_v56  ;;  %v227_v60 = vld [vmem:[#allocation2 + $0x118] sm:$0xff]  ;;  %v304_v62 = vld [vmem:[%s918_s2] sm:$0xff]  ;;  %v305_v63 = vld [vmem:[%s918_s2 + $0x8] sm:$0xff]  ;;  %v408_v40 = vsub.s32 0, %v407_v39 }
  0x21   :  { %624 = vmatprep.subr.bf16.mxu1 %v754_v0  ;;  %v661_v61 = vpack.c.bf16 %v227_v60, %v226_v59  ;;  %v664_v2 = vpack.c.bf16 %v305_v63, %v304_v62  ;;  %v307_v3 = vld [vmem:[%s918_s2 + $0x18] sm:$0xff]  ;;  %v308_v5 = vld [vmem:[%s918_s2 + $0x20] sm:$0xff]  ;;  %v309_v6 = vld [vmem:[%s918_s2 + $0x28] sm:$0xff] }
  0x22   :  { %v670_v7 = vpack.c.bf16 %v309_v6, %v308_v5  ;;  %v310_v8 = vld [vmem:[%s918_s2 + $0x30] sm:$0xff]  ;;  %v311_v9 = vld [vmem:[%s918_s2 + $0x38] sm:$0xff]  ;;  %v312_v11 = vld [vmem:[%s918_s2 + $0x40] sm:$0xff] }
  0x23   :  { %644 = vmatpush3.bf16.msra.mxu0 %v643_v38  ;;  %v673_v10 = vpack.c.bf16 %v311_v9, %v310_v8  ;;  %v313_v12 = vld [vmem:[%s918_s2 + $0x48] sm:$0xff]  ;;  %v433_v14 = vld [vmem:[%s919_s3 + $0x1] ss:$0 sm:$0xff]  ;;  %v314_v19 = vld [vmem:[%s918_s2 + $0x50] sm:$0xff] }
  0x24   :  { %626 = vmatpush3.bf16.msra.mxu1 %v625_v20  ;;  %645 = vmatprep.subr.bf16.mxu0 %v754_v0  ;;  %v676_v13 = vpack.c.bf16 %v313_v12, %v312_v11  ;;  %v315_v20 = vld [vmem:[%s918_s2 + $0x58] sm:$0xff]  ;;  %v316_v22 = vld [vmem:[%s918_s2 + $0x60] sm:$0xff]  ;;  %v318_v25 = vld [vmem:[%s918_s2 + $0x70] sm:$0xff] }
  0x25   :  { %627 = vmatprep.subr.bf16.mxu1 %v754_v0  ;;  %v679_v21 = vpack.c.bf16 %v315_v20, %v314_v19  ;;  %v434_v28 = vld [vmem:[%s919_s3 + $0x2] ss:$0 sm:$0xff]  ;;  %v435_v33 = vld [vmem:[%s920_s4] ss:$0 sm:$0xff] }
  0x27   :  { %647 = vmatpush3.bf16.msra.mxu0 %v646_v41  ;;  %v757_v41 = vmov 0  }
  0x28   :  { %629 = vmatpush3.bf16.msra.mxu1 %v628_v23  ;;  %648 = vmatprep.subr.bf16.mxu0 %v754_v0  ;;  %v317_v23 = vld [vmem:[%s918_s2 + $0x68] sm:$0xff] }
  0x29   :  { %630 = vmatprep.subr.bf16.mxu1 %v754_v0  ;;  %v682_v24 = vpack.c.bf16 %v317_v23, %v316_v22 }
  0x2b   :  { %650 = vmatpush3.bf16.msra.mxu0 %v649_v44  ;;  %v436_v44 = vld [vmem:[%s920_s4 + $0x1] ss:$0 sm:$0xff] }
  0x2c   :  { %632 = vmatpush3.bf16.msra.mxu1 %v631_v26  ;;  %651 = vmatprep.subr.bf16.mxu0 %v754_v0  ;;  %v319_v26 = vld [vmem:[%s918_s2 + $0x78] sm:$0xff] }
  0x2d   :  { %633 = vmatprep.subr.bf16.mxu1 %v754_v0  ;;  %v685_v27 = vpack.c.bf16 %v319_v26, %v318_v25 }
  0x2f   :  { %653 = vmatpush3.bf16.msra.mxu0 %v652_v47 }
  0x30   :  { %635 = vmatpush3.bf16.msra.mxu1 %v634_v29  ;;  %654 = vmatprep.subr.bf16.mxu0 %v754_v0 }
  0x31   :  { %636 = vmatprep.subr.bf16.mxu1 %v754_v0 }
  0x33   :  { %656 = vmatpush3.bf16.msra.mxu0 %v655_v55 }
  0x34   :  { %638 = vmatpush3.bf16.msra.mxu1 %v637_v32  ;;  %657 = vmatprep.subr.bf16.mxu0 %v754_v0 }
  0x35   :  { %663 = vmatprep.subr.bf16.mxu1 %v754_v0 }
  0x37   :  { %659 = vmatpush3.bf16.msra.mxu0 %v658_v58 }
  0x38   :  { %660 = vmatprep.subr.bf16.mxu0 %v754_v0 }
  0x3b   :  { %662 = vmatpush3.bf16.msra.mxu0 %v661_v61 }
  0xf1   :  { %v115_v49 = vpop.f32.mrb[0].mxu0 }
  0xf2   :  { %v116_v50 = vadd.f32 %v431_v48, %v115_v49  ;;  %v503_v51 = vpop.f32.mrb[1].mxu0 }
  0xf4   :  { %695 = vtanh.f32 %v116_v50 }
  0xfe   :  { %v696_v52 = vpop.eup %695 }
  0xff   :  { %537 = vmatmul.mubr.f32.vlgmr.msra.gmra.mrb[0].mxu1 %v696_v52 }
 0x100   :  { %606 = vmatprep.mubr.msk.f32.mxu1 %vm755_vm0, %v756_v1  ;;  %v306_v1 = vld [vmem:[%s918_s2 + $0x10] sm:$0xff]  ;;  %665 = vmatpush3.bf16.msra.mxu1 %v664_v2 }
 0x101   :  { %v667_v4 = vpack.c.bf16 %v307_v3, %v306_v1  ;;  %666 = vmatprep.subr.bf16.mxu1 %v754_v0 }
 0x104   :  { %668 = vmatpush3.bf16.msra.mxu1 %v667_v4 }
 0x105   :  { %669 = vmatprep.subr.bf16.mxu1 %v754_v0 }
 0x108   :  { %671 = vmatpush3.bf16.msra.mxu1 %v670_v7 }
 0x109   :  { %672 = vmatprep.subr.bf16.mxu1 %v754_v0 }
 0x10c   :  { %674 = vmatpush3.bf16.msra.mxu1 %v673_v10 }
 0x10d   :  { %675 = vmatprep.subr.bf16.mxu1 %v754_v0 }
 0x110   :  { %677 = vmatpush3.bf16.msra.mxu1 %v676_v13 }
 0x111   :  { %678 = vmatprep.subr.bf16.mxu1 %v754_v0 }
 0x114   :  { %680 = vmatpush3.bf16.msra.mxu1 %v679_v21 }
 0x115   :  { %681 = vmatprep.subr.bf16.mxu1 %v754_v0 }
 0x118   :  { %683 = vmatpush3.bf16.msra.mxu1 %v682_v24 }
 0x119   :  { %684 = vmatprep.subr.bf16.mxu1 %v754_v0  ;;  %v396_v0 = vld [vmem:[%s920_s4 + $0x2] sm:$0x1] }
 0x11a   :  { %vm397_vm2 = vcmp.gt.f32.partialorder %v396_v0, 0.0 }
 0x11b   :  { %v405_v42 = vsel %vm397_vm2, 1, %v757_v41 }
 0x11c   :  { %686 = vmatpush3.bf16.msra.mxu1 %v685_v27  ;;  %v409_v43 = vrot.slane %v405_v42, %v408_v40 }
 0x11e   :  { %vm410_vm3 = vcmp.eq.s32.totalorder %v409_v43, 1 }
 0x1d2   :  { %v207_v15 = vpop.f32.mrb[0].mxu1 }
 0x1d3   :  { %v208_v16 = vadd.f32 %v433_v14, %v207_v15  ;;  %v538_v17 = vpop.f32.mrb[1].mxu1 }
 0x1d5   :  { %697 = vtanh.f32 %v208_v16 }
 0x1df   :  { %v698_v18 = vpop.eup %697 }
 0x1e0   :  { %572 = vmatmul.mubr.f32.vlgmr.msra.gmra.mrb[2].mxu0 %v698_v18 }
 0x2b3   :  { %v299_v29 = vpop.f32.mrb[2].mxu0 }
 0x2b4   :  { %v300_v30 = vadd.f32 %v434_v28, %v299_v29  ;;  %v573_v31 = vpop.f32.mrb[3].mxu0 }
 0x2b6   :  { %699 = vtanh.f32 %v300_v30 }
 0x2c0   :  { %v700_v32 = vpop.eup %699 }
 0x2c1   :  { %607 = vmatmul.mubr.f32.vlgmr.msra.gmra.mrb[2].mxu1 %v700_v32 }
 0x394   :  { %v391_v35 = vpop.f32.mrb[2].mxu1 }
 0x395   :  { %v392_v36 = vadd.f32 %v435_v33, %v391_v35  ;;  %v608_v37 = vpop.f32.mrb[3].mxu1 }
 0x397   :  { %v398_v38 = vmul.f32 1.442695, %v392_v36 }
 0x399   :  { %701 = vpow2.f32 %v398_v38 }
 0x3a3   :  { %v702_v45 = vpop.eup %701 }
 0x3a4   :  { %v404_v46 = vmul.f32 %v702_v45, %v436_v44 }
 0x3a6   :  { %v411_v47 = vsel %vm410_vm3, %v404_v46, %v392_v36 }
 0x3a7   :  { %v412_v48 = vmax.f32 %v411_v47, 1e-10 }
 0x3a9   :  { %v413_v49 = vmin.f32 %v412_v48, 1e+10 }
 0x3ab   :  { %415 = vst.msk [vmem:[#allocation5] sm:$0xff] %vm414_vm4, %v413_v49 }
 0x3ac   :  { %736 = shalt.err (!%p733_p12)
}
 0x3ad   :  { %s737_s26 = scalar_lea.hbm %s921_s5, 128 }
 0x3ae   :  { %p738_p13 = scmp.ne.s32.totalorder %s921_s5, %s737_s26  ;;  %p741_p0 = scmp.lt.u32.totalorder %s737_s26, %s921_s5 }
 0x3b0   :  { %p743_p1 = pnand %p741_p0, %p738_p13 }
 0x3b2   :  { %746 = shalt.err (!%p743_p1)
}
 0x3b3   :  { %425 = dma.vmem_to_hbm [thread:$0]  %s423_s23, 128, %s921_s5, [#allocation4]  }
 0x3b4   :  { %749 = dma.done.wait [#allocation4], 128  }
 0x3b5   :  { %750 = vsyncadd [#allocation4], 4294967168 }
 0x3b6   :  { %429 = vsyncpa [#allocation3], 1 }
 0x3b7   :  { %430 = vsyncpa [#allocation4], 1 }

</bundles_post_ra>
